<compile_context>
chip_gen: v6e
topology: v6e:2x2x1
jax: 0.10.0
libtpu: 0.0.40
codegen_flags: <defaults>
</compile_context>

<pallas_src>
import functools
from math import sqrt

import jax
import jax.numpy as jnp
from jax import lax
from jax.experimental import pallas as pl
from jax.experimental.pallas import tpu as pltpu


def _round_up(x, m):
    return ((x + m - 1) // m) * m


def _self_attention_kernel(x_ref, w_ref, b_ref, o_ref, *, seq_len, de_p):
    # x_ref: (Bt*S, Din) f32 | w_ref: (Din, 3*De_p) bf16 | b_ref: (1, 3*De_p) f32
    # o_ref: (Bt*S, De_p)
    rows, _ = x_ref.shape
    bt = rows // seq_len

    # In-kernel bf16 cast (VPU, hides under the MXU slot) -- avoids a separate HBM pass over x.
    x2 = x_ref[...].astype(jnp.bfloat16)

    # Fused QKV projection: one (rows, Din) x (Din, 3*De_p) bf16 matmul, f32 accumulation.
    qkv = jnp.dot(x2, w_ref[...], preferred_element_type=jnp.float32) + b_ref[...]

    # Static, lane-aligned (multiples of 128) splits. The softmax 1/sqrt(De) scale is already
    # folded into the Q section of the fused weight/bias in the wrapper.
    q = qkv[:, :de_p]
    k = qkv[:, de_p:2 * de_p]
    v = qkv[:, 2 * de_p:3 * de_p]

    q3 = q.reshape(bt, seq_len, de_p).astype(jnp.bfloat16)
    k3 = k.reshape(bt, seq_len, de_p).astype(jnp.bfloat16)
    v3 = v.reshape(bt, seq_len, de_p).astype(jnp.bfloat16)

    # Attention scores: contract K on its last dim directly (no materialized transpose).
    # Padded De lanes are exactly zero (zero-padded weights/bias) so they contribute nothing.
    scores = lax.dot_general(
        q3, k3,
        dimension_numbers=(((2,), (2,)), ((0,), (0,))),
        preferred_element_type=jnp.float32)                         # (bt, S, S) f32

    # TODO(synk): optional `mask` argument (masked_fill with -inf) not wired in; the reference
    # forward is exercised with mask=None.
    # TODO(synk): for production S (>= ~1-2K, esp. v7x 64 MiB VMEM) add a KV-tile grid axis with
    # flash-style online softmax instead of materializing the full (S, S) scores.

    # Numerically stable softmax, kept in f32 (v5e VPU/EUP have no bf16 path).
    m = jnp.max(scores, axis=-1, keepdims=True)
    p = jnp.exp(scores - m)
    inv = pl.reciprocal(jnp.sum(p, axis=-1, keepdims=True), approx=True)
    w = (p * inv).astype(jnp.bfloat16)                               # bf16 for the MXU

    out = lax.dot_general(
        w, v3,
        dimension_numbers=(((2,), (1,)), ((0,), (0,))),
        preferred_element_type=jnp.float32)                          # (bt, S, De_p) f32

    # Lane-dense 2-D store (De_p is a multiple of 128 -> unmasked vst).
    o_ref[...] = out.reshape(rows, de_p).astype(o_ref.dtype)


def self_attention(x, wq, wk, wv, bq, bk, bv, *, batch_tile=None):
    """x: (B, S, Din); w*: (Din, De); b*: (De,). Returns (B, S, De) in x.dtype."""
    B, S, Din = x.shape
    De = wq.shape[1]
    scale = 1.0 / sqrt(De)

    # Pad the embed dim to a lane-dense multiple of 128; padded columns are exact zeros.
    De_p = _round_up(De, 128)

    def pad_w(w):
        return jnp.pad(w.astype(jnp.float32), ((0, 0), (0, De_p - De)))

    def pad_b(b):
        return jnp.pad(b.astype(jnp.float32), (0, De_p - De))

    # Fuse Wq/Wk/Wv -> (Din, 3*De_p) bf16 and biases -> (1, 3*De_p) f32, with the softmax scale
    # folded into the Q section (done once in f32; step-invariant).
    w_qkv = jnp.concatenate([pad_w(wq) * scale, pad_w(wk), pad_w(wv)],
                            axis=1).astype(jnp.bfloat16)
    b_qkv = jnp.concatenate([pad_b(bq) * scale, pad_b(bk), pad_b(bv)]).reshape(1, 3 * De_p)

    # Flatten x in the wrapper (free HBM metadata reshape) -> clean 2-D sublane-dense block.
    x_flat = x.reshape(B * S, Din)

    # Batch tile: target ~256 projection rows per grid step (fills the v6e/v7x 256-wide MXU M
    # dim; harmless on v5e), keep the grid >= 2 when B >= 2 so both v7x TensorCores get work,
    # and shrink to a divisor of B so every block is full.
    if batch_tile is None:
        batch_tile = max(1, min(B, pl.cdiv(256, S)))
        if B >= 2:
            batch_tile = min(batch_tile, B // 2)
        while B % batch_tile != 0:
            batch_tile -= 1
    Bt = batch_tile
    assert B % Bt == 0 and Bt >= 1

    out_dtype = x.dtype
    rows = Bt * S

    # Explicit VMEM budget: pipelined blocks + compiler-managed intermediates, with headroom,
    # capped at v7x's 64 MiB physical VMEM.
    est = (2 * rows * Din * 4                              # x block (double-buffered)
           + Din * 3 * De_p * 2 + 3 * De_p * 4             # fused weights (single-buf) + bias
           + 2 * rows * De_p * jnp.dtype(out_dtype).itemsize  # out block (double-buffered)
           + rows * 3 * De_p * 4                           # qkv f32
           + 3 * rows * De_p * 2                           # q/k/v bf16
           + 2 * Bt * S * S * 4 + Bt * S * S * 2           # scores/p f32 + probs bf16
           + rows * De_p * 4)                              # out f32
    vmem_limit = int(min(64 * 2 ** 20, max(32 * 2 ** 20, 4 * est)))

    kernel = functools.partial(_self_attention_kernel, seq_len=S, de_p=De_p)

    out_padded = pl.pallas_call(
        kernel,
        out_shape=jax.ShapeDtypeStruct((B * S, De_p), out_dtype),
        grid_spec=pltpu.PrefetchScalarGridSpec(
            num_scalar_prefetch=0,
            grid=(B // Bt,),
            in_specs=[
                pl.BlockSpec((Bt * S, Din), lambda b: (b, 0)),        # x rows for this step
                pl.BlockSpec((Din, 3 * De_p), lambda b: (0, 0),
                             pipeline_mode=pl.Buffered(1)),           # fused W (resident)
                pl.BlockSpec((1, 3 * De_p), lambda b: (0, 0),
                             pipeline_mode=pl.Buffered(1)),           # fused bias (resident)
            ],
            out_specs=pl.BlockSpec((Bt * S, De_p), lambda b: (b, 0)),
        ),
        compiler_params=pltpu.CompilerParams(
            dimension_semantics=("parallel",),
            vmem_limit_bytes=vmem_limit),
    )(x_flat, w_qkv, b_qkv)

    return out_padded[:, :De].reshape(B, S, De)


def _reference(x, wq, wk, wv, bq, bk, bv):
    De = wq.shape[1]
    q = x @ wq + bq
    k = x @ wk + bk
    v = x @ wv + bv
    scores = jnp.einsum("bqd,bkd->bqk", q, k) / sqrt(De)
    w = jax.nn.softmax(scores, axis=-1)
    return jnp.einsum("bqk,bkd->bqd", w, v)


if __name__ == "__main__":
    B, S, Din, De = 2, 8, 32, 32

    key = jax.random.PRNGKey(0)
    kx, kq, kk, kv, kbq, kbk, kbv = jax.random.split(key, 7)

    x = jax.random.normal(kx, (B, S, Din), dtype=jnp.float32)
    # Deterministic parameter init (synthetic; mimics nn.Linear uniform scale).
    bound = 1.0 / sqrt(Din)
    wq = jax.random.uniform(kq, (Din, De), jnp.float32, -bound, bound)
    wk = jax.random.uniform(kk, (Din, De), jnp.float32, -bound, bound)
    wv = jax.random.uniform(kv, (Din, De), jnp.float32, -bound, bound)
    bq = jax.random.uniform(kbq, (De,), jnp.float32, -bound, bound)
    bk = jax.random.uniform(kbk, (De,), jnp.float32, -bound, bound)
    bv = jax.random.uniform(kbv, (De,), jnp.float32, -bound, bound)

    out = self_attention(x, wq, wk, wv, bq, bk, bv)
    jax.block_until_ready(out)

    ref = _reference(x, wq, wk, wv, bq, bk, bv)
    assert out.shape == (B, S, De)
    # bf16 MXU inputs => expect ~1e-2-level relative error vs the f32 reference.
    assert jnp.allclose(out, ref, atol=2e-2, rtol=2e-2), "mismatch vs reference"

    print("KERNEL_OK")
</pallas_src>

<mosaic_0001>
module attributes {stable_mosaic.version = 11 : i64} {
  func.func @_self_attention_kernel(%arg0: i32, %arg1: memref<8x32xf32, #tpu.memory_space<vmem>>, %arg2: memref<32x384xbf16, #tpu.memory_space<vmem>>, %arg3: memref<1x384xf32, #tpu.memory_space<vmem>>, %arg4: memref<8x128xf32, #tpu.memory_space<vmem>>) attributes {dimension_semantics = [#tpu.dimension_semantics<parallel>], iteration_bounds = array<i64: 2>, scalar_prefetch = 0 : i64, scratch_operands = 0 : i64, tpu.core_type = #tpu.core_type<tc>, window_params = [{transform_indices = @transform_0, window_bounds = array<i64: 8, 32>}, {pipeline_mode = #tpu.pipeline_mode<synchronous>, transform_indices = @transform_1, window_bounds = array<i64: 32, 384>}, {pipeline_mode = #tpu.pipeline_mode<synchronous>, transform_indices = @transform_2, window_bounds = array<i64: 1, 384>}, {transform_indices = @transform_3, window_bounds = array<i64: 8, 128>}]} {
    %c0 = arith.constant 0 : index
    %c0_0 = arith.constant 0 : index
    %0 = vector.load %arg1[%c0, %c0_0] : memref<8x32xf32, #tpu.memory_space<vmem>>, vector<8x32xf32>
    %1 = arith.truncf %0 : vector<8x32xf32> to vector<8x32xbf16>
    %c0_1 = arith.constant 0 : index
    %c0_2 = arith.constant 0 : index
    %2 = vector.load %arg2[%c0_1, %c0_2] : memref<32x384xbf16, #tpu.memory_space<vmem>>, vector<32x384xbf16>
    %cst = arith.constant dense<0.000000e+00> : vector<8x384xf32>
    %3 = tpu.matmul %1, %2, %cst {dimension_numbers = #tpu.dot_dimension_numbers<[1], [0], [0], [1], [0, 0, 1, 1], [], []>} : vector<8x32xbf16>, vector<32x384xbf16>, vector<8x384xf32> -> vector<8x384xf32>
    %c0_3 = arith.constant 0 : index
    %c0_4 = arith.constant 0 : index
    %4 = vector.load %arg3[%c0_3, %c0_4] : memref<1x384xf32, #tpu.memory_space<vmem>>, vector<1x384xf32>
    %5 = vector.broadcast %4 : vector<1x384xf32> to vector<8x384xf32>
    %6 = arith.addf %3, %5 : vector<8x384xf32>
    %7 = vector.extract_strided_slice %6 {offsets = [0, 0], sizes = [8, 128], strides = [1, 1]} : vector<8x384xf32> to vector<8x128xf32>
    %8 = vector.extract_strided_slice %6 {offsets = [0, 128], sizes = [8, 128], strides = [1, 1]} : vector<8x384xf32> to vector<8x128xf32>
    %9 = vector.extract_strided_slice %6 {offsets = [0, 256], sizes = [8, 128], strides = [1, 1]} : vector<8x384xf32> to vector<8x128xf32>
    %10 = vector.shape_cast %7 : vector<8x128xf32> to vector<1x8x128xf32>
    %11 = arith.truncf %10 : vector<1x8x128xf32> to vector<1x8x128xbf16>
    %12 = vector.shape_cast %8 : vector<8x128xf32> to vector<1x8x128xf32>
    %13 = arith.truncf %12 : vector<1x8x128xf32> to vector<1x8x128xbf16>
    %14 = vector.shape_cast %9 : vector<8x128xf32> to vector<1x8x128xf32>
    %15 = arith.truncf %14 : vector<1x8x128xf32> to vector<1x8x128xbf16>
    %cst_5 = arith.constant dense<0.000000e+00> : vector<1x8x8xf32>
    %16 = tpu.matmul %11, %13, %cst_5 {dimension_numbers = #tpu.dot_dimension_numbers<[2], [2], [1], [1], [0, 0, 0, 1, 1, 1], [0], [0]>} : vector<1x8x128xbf16>, vector<1x8x128xbf16>, vector<1x8x8xf32> -> vector<1x8x8xf32>
    %cst_6 = arith.constant dense<0xFF800000> : vector<1x8xf32>
    %17 = vector.multi_reduction <maximumf>, %16, %cst_6 [2] : vector<1x8x8xf32> to vector<1x8xf32>
    %18 = vector.shape_cast %17 : vector<1x8xf32> to vector<1x8x1xf32>
    %19 = vector.broadcast %18 : vector<1x8x1xf32> to vector<1x8x8xf32>
    %20 = arith.subf %16, %19 : vector<1x8x8xf32>
    %21 = math.exp %20 : vector<1x8x8xf32>
    %cst_7 = arith.constant dense<0.000000e+00> : vector<1x8xf32>
    %22 = vector.multi_reduction <add>, %21, %cst_7 [2] : vector<1x8x8xf32> to vector<1x8xf32>
    %23 = vector.shape_cast %22 : vector<1x8xf32> to vector<1x8x1xf32>
    %24 = tpu.reciprocal %23 {approx = true} : vector<1x8x1xf32> -> vector<1x8x1xf32>
    %25 = vector.broadcast %24 : vector<1x8x1xf32> to vector<1x8x8xf32>
    %26 = arith.mulf %21, %25 : vector<1x8x8xf32>
    %27 = arith.truncf %26 : vector<1x8x8xf32> to vector<1x8x8xbf16>
    %cst_8 = arith.constant dense<0.000000e+00> : vector<1x8x128xf32>
    %28 = tpu.matmul %27, %15, %cst_8 {dimension_numbers = #tpu.dot_dimension_numbers<[2], [1], [1], [2], [0, 0, 0, 1, 1, 2], [0], [0]>} : vector<1x8x8xbf16>, vector<1x8x128xbf16>, vector<1x8x128xf32> -> vector<1x8x128xf32>
    %29 = vector.shape_cast %28 : vector<1x8x128xf32> to vector<8x128xf32>
    %c0_9 = arith.constant 0 : index
    %c0_10 = arith.constant 0 : index
    %30 = vector.load %arg4[%c0_9, %c0_10] : memref<8x128xf32, #tpu.memory_space<vmem>>, vector<8x128xf32>
    tpu.vector_store %arg4[%c0_9, %c0_10], %29 {strides = array<i32>} : memref<8x128xf32, #tpu.memory_space<vmem>>, vector<8x128xf32>,
    return
  }
  func.func @transform_0(%arg0: i32) -> (i32, i32) {
    %c0_i32 = arith.constant 0 : i32
    %c0_i32_0 = arith.constant 0 : i32
    return %arg0, %c0_i32 : i32, i32
  }
  func.func @transform_1(%arg0: i32) -> (i32, i32) {
    %c0_i32 = arith.constant 0 : i32
    %c0_i32_0 = arith.constant 0 : i32
    %c0_i32_1 = arith.constant 0 : i32
    return %c0_i32, %c0_i32_0 : i32, i32
  }
  func.func @transform_2(%arg0: i32) -> (i32, i32) {
    %c0_i32 = arith.constant 0 : i32
    %c0_i32_0 = arith.constant 0 : i32
    %c0_i32_1 = arith.constant 0 : i32
    return %c0_i32, %c0_i32_0 : i32, i32
  }
  func.func @transform_3(%arg0: i32) -> (i32, i32) {
    %c0_i32 = arith.constant 0 : i32
    %c0_i32_0 = arith.constant 0 : i32
    return %arg0, %c0_i32 : i32, i32
  }
}

</mosaic_0001>

<bundles_post_ra>
// kernel: tpu_custom_call.1
= control target key start
LH: loop header
LB: loop body
LE: loop exit
PB: predicated region body
PF: predicated region fallthrough
CT: control target
= control target key end

     0   :  { %8 = vsyncpa [#allocation3], 0  ;;  %s1001_s0 = inlined_call_operand.hbm [shape: f32[16,32], index: 0, kind: input, shape index: {}]   ;;  %s1002_s1 = inlined_call_operand.hbm [shape: bf16[32,384], index: 1, kind: input, shape index: {}]   ;;  %s1003_s2 = inlined_call_operand.vmem [shape: f32[1,384], index: 2, kind: input, shape index: {}]   ;;  %s1004_s3 = inlined_call_operand.hbm [shape: f32[16,128], index: 3, kind: output, shape index: {}]  }
   0x1   :  { %10 = vsyncpa [#allocation3 + $0x1], 0 }
   0x2   :  { %11 = vsyncpa [#allocation6], 0 }
   0x3   :  { %12 = vsyncpa [#allocation4], 0 }
   0x4   :  { %14 = vsyncpa [#allocation4 + $0x1], 0  ;;  %s820_s12 = smov 0   ;;  %s822_s13 = smov 0  }
   0x5   :  { %s824_s14 = smov 0   ;;  %s826_s15 = smov 0  }
   0x6 LB: > { %s841_s16 = sadd.s32 4294967295, %s790_s15   ;;  %s544_s17 = sadd.s32 4294967294, %s790_s15   ;;  %s790_s15 = sphi %s826_s15, %s1026_s15   ;;  %s786_s14 = sphi %s824_s14, %s1025_s14   ;;  %s782_s13 = sphi %s822_s13, %s1024_s13   ;;  %s778_s12 = sphi %s820_s12, %s1023_s12  }
   0x7   : > { %p40_p0 = scmp.ne.s32.totalorder %s782_s13, %s778_s12  ;;  %p1005_p1 = scmp.eq.s32.totalorder %s841_s16, 0 }
   0x8   : > { %p112_p3 = scmp.eq.s32.totalorder %s544_s17, 1  ;;  %p545_p5 = scmp.ge.s32.totalorder %s790_s15, 1 }
   0x9   : > { %p850_p4 = por %p1005_p1, %p40_p0  ;;  %p119_p7 = scmp.lt.s32.totalorder %s790_s15, 3 }
   0xa   : > { %p855_p6 = por %p112_p3, %p40_p0  ;;  %s792_s21 = smov [#allocation5]  }
   0xb   : > { %s1009_s18 = scalar_select %p850_p4, 1, 0 }
   0xc   : > { %s1010_s19 = scalar_select %p855_p6, 1, 0 }
   0xd   : > { %p860_p8 = pnand %p545_p5, %p119_p7  ;;  %s131_s22 = sshll.u32 %s792_s21, 4  ;;  %s132_s22 = int_to_ptr.vmem [resolvable:$true] %s131_s22 }
   0xe   : > { %s874_s24 = sadd.s32 1, %s790_s15   ;;  %s27_s25 = sadd.s32 1, %s786_s14 }
   0xf   : > { %s1011_s20 = scalar_select %p860_p8, 1, 0 }
  0x10   : > { %p602_p9 = pneg %p860_p8  ;;  %s24_s26 = ssub.s32 %s790_s15, %s874_s24 }
  0x11   : > { %s679_s27 = scalar_lea.vmem %s132_s22, 768  ;;  %p687_p5 = scmp.lt.s32.totalorder %s132_s22, %s132_s22 }
  0x12   : > { %p869_p11 = pnand %p602_p9, %p1005_p1  ;;  %p680_p13 = scmp.ne.s32.totalorder %s132_s22, %s679_s27 }
  0x13   : > { %p688_p7 = scmp.lt.s32.totalorder %s679_s27, %s679_s27 }
  0x14   : > { %p670_p12 = pneg %p869_p11 }
  0x15   : > { %p689_p10 = por %p688_p7, %p687_p5 }
  0x16   : > { %p682_p0 = pnand %p680_p13, %p670_p12 }
  0x18   : > { %p683_p3 = pneg %p682_p0 }
  0x1a   : > { %p690_p2 = pnand %p689_p10, %p683_p3 }
  0x1c   : > { %693 = shalt.err (!%p690_p2)
}
  0x1d   : > { %s793_s28 = smov 192   ;;  %s794_s29 = smov 12  }
  0x1e   : > { %605 = dma.hbm_to_vmem [thread:$0]  (!%p869_p11), %s1002_s1, 768, %s132_s22, [#allocation6], %s793_s28, %s793_s28, %s794_s29  }
  0x1f   : > { %p25_p9 = scmp.eq.s32.totalorder %s24_s26, 0  ;;  %p34_p12 = scmp.ne.s32.totalorder %s786_s14, %s782_s13 }
  0x20   : > { %p35_p10 = scmp.eq.s32.totalorder %s790_s15, 0  ;;  %p615_p2 = scmp.lt.s32.totalorder %s790_s15, 2 }
  0x21   : > { %s891_s5 = scalar_select %p25_p9, %s786_s14, %s27_s25  }
  0x22   : > { %p36_p13 = por %p35_p10, %p34_p12  ;;  %p1013_p0 = scmp.eq.s32.totalorder %s841_s16, 1 }
  0x23   : > { %s148_s7 = sand.u32 1, %s786_s14   ;;  %s549_s8 = sshll.u32 %s790_s15, 7 }
  0x24   : > { %p895_p3 = por %p1013_p0, %p34_p12  ;;  %s548_s9 = sshll.u32 %s148_s7, 3 }
  0x25   : > { %s904_s17 = scalar_lea.hbm %s1001_s0, %s549_s8  ;;  %s152_s21 = scalar_lea.vmem [#allocation2], %s548_s9 }
  0x26   : > { %s1014_s6 = scalar_select %p895_p3, 1, 0 }
  0x27   : > { %s159_s22 = sshll.u32 %s152_s21, 4  ;;  %p906_p11 = pnand %p615_p2, %p36_p13  ;;  %s160_s22 = int_to_ptr.vmem [resolvable:$true] %s159_s22 }
  0x28   : > { %s149_s25 = scalar_lea.sflag [#allocation3], %s148_s7  ;;  %s694_s26 = scalar_lea.hbm %s904_s17, 128 }
  0x29   : > { %p695_p5 = scmp.ne.s32.totalorder %s904_s17, %s694_s26  ;;  %p696_p7 = pneg %p906_p11 }
  0x2a   : > { %s699_s29 = scalar_lea.hbm %s1001_s0, 256  ;;  %p700_p10 = scmp.lt.s32.totalorder %s904_s17, %s1001_s0 }
  0x2b   : > { %p697_p9 = pnand %p696_p7, %p695_p5  ;;  %p701_p2 = scmp.lt.s32.totalorder %s699_s29, %s694_s26 }
  0x2d   : > { %p698_p12 = pneg %p697_p9  ;;  %p702_p13 = por %p701_p2, %p700_p10 }
  0x2f   : > { %p703_p0 = pnand %p702_p13, %p698_p12 }
  0x31   : > { %706 = shalt.err (!%p703_p0)
}
  0x32   : > { %s707_s8 = scalar_lea.vmem %s160_s22, 128  ;;  %s795_s7 = smov [#allocation2]  }
  0x33   : > { %p708_p1 = scmp.ne.s32.totalorder %s160_s22, %s707_s8  ;;  %s712_s9 = sshll.u32 %s795_s7, 4  ;;  %s713_s9 = int_to_ptr.vmem [resolvable:$false] %s712_s9 }
  0x34   : > { %s714_s10 = scalar_lea.vmem %s713_s9, 256  ;;  %p715_p5 = scmp.lt.s32.totalorder %s160_s22, %s713_s9 }
  0x35   : > { %p710_p6 = pnand %p708_p1, %p696_p7  ;;  %p716_p9 = scmp.lt.s32.totalorder %s714_s10, %s707_s8 }
  0x37   : > { %p711_p3 = pneg %p710_p6  ;;  %p717_p4 = por %p716_p9, %p715_p5 }
  0x39   : > { %p718_p8 = pnand %p717_p4, %p711_p3 }
  0x3b   : > { %721 = shalt.err (!%p718_p8)
}
  0x3c   : > { %609 = dma.hbm_to_vmem [thread:$0]  (!%p906_p11), %s904_s17, 128, %s160_s22, %s149_s25  }
  0x3d   : > { %p1016_p12 = scmp.ne.s32.totalorder %s1011_s20, 0 }
  0x3e   : > { %s927_s11 = sand.u32 (!%p1016_p12), 1, %s782_s13   ;;  %p1017_p1 = scmp.ne.s32.totalorder (!%p1016_p12), %s1009_s18, 0 }
  0x3f   : > { %168 = sbr.rel (%p1016_p12) target bundleno = 1003 (0x3eb), region = 32  ;;  %s551_s21 = sshll.u32 (!%p1016_p12), %s927_s11, 3 }
  0x40   : > { %s171_s26 = scalar_lea.sflag (!%p1016_p12), [#allocation3], %s927_s11  ;;  %s174_s27 = scalar_lea.vmem (!%p1016_p12), [#allocation2], %s551_s21 }
  0x44   : > { %765 = dma.done.wait (%p1017_p1), %s171_s26, 128  }
  0x45   : > { %767 = vsyncadd (%p1017_p1), %s171_s26, 4294967168  ;;  %p1018_p4 = scmp.eq.s32.totalorder %s841_s16, 0 }
  0x47   : > { %769 = dma.done.wait (%p1018_p4), [#allocation6], 768   ;;  %p1019_p6 = pmov %p1018_p4 }
  0x48   : > { %v796_v0 = vmov 0   ;;  %v656_v1 = vld [vmem:[#allocation5 + $0x1c] ss:$12 sps:$4 sm:$0xff]   ;;  %v658_v2 = vld [vmem:[#allocation5 + $0x18] ss:$12 sps:$4 sm:$0xff]   ;;  %vm261_vm0 = vcmask 261120   ;;  %v214_v8 = vlaneseq }
  0x49   : > { %771 = vsyncadd (%p1019_p6), [#allocation6], 4294966528  ;;  %297 = vmatprep.mubr.bf16.mxu0 %v796_v0  ;;  %277 = vmatprep.subr.bf16.mxu0 %v656_v1  ;;  %v659_v3 = vld [vmem:[#allocation5 + $0x4] ss:$12 sps:$4 sm:$0xff]   ;;  %v661_v4 = vld [vmem:[#allocation5] ss:$12 sps:$4 sm:$0xff]  }
  0x4a   : > { %278 = vmatpush1.bf16.msra.mxu0 %v658_v2  ;;  %v202_v5 = vld [vmem:[%s174_s27] sm:$0xff]  ;;  %v797_v7 = vmov 0.0   ;;  %vm798_vm1 = vmmov 0   ;;  %v215_v9 = vshrl.u32 %v214_v8, 7  ;;  %v662_v23 = vld [vmem:[#allocation5 + $0x20] ss:$12 sps:$4 sm:$0xff]  }
  0x4b   : > { %279 = vmatprep.subr.bf16.mxu0 %v659_v3  ;;  %v203_v6 = vpack.c.bf16 %v202_v5, %v202_v5  ;;  %574 = vmatprep.subr.bf16.mxu1 %v797_v7  ;;  %v212_v11 = vld [vmem:[%s1003_s2] sm:$0x7]  ;;  %v663_v24 = vld [vmem:[#allocation5 + $0x8] ss:$12 sps:$4 sm:$0xff]   ;;  %vm389_vm2 = vcmask 64512   ;;  %vm405_vm3 = vcmask 1043456  }
  0x4c   : > { %578 = vmatprep.mubr.msk.bf16.mxu1 %vm798_vm1, %v797_v7  ;;  %v220_v10 = vsub.s32 1, %v215_v9  ;;  %v216_v13 = vsub.s32 0, %v215_v9  ;;  %575 = vmatpush3.bf16.msra.mxu1 %v662_v23  ;;  %v224_v30 = vsub.s32 2, %v215_v9  ;;  %s200_s17 = scalar_lea.vmem [#allocation7], %s551_s21  ;;  %s564_s23 = sshll.u32 %s841_s16, 7 }
  0x4d   : > { %576 = vmatprep.subr.bf16.mxu1 %v797_v7  ;;  %s464_s22 = sshll.u32 %s200_s17, 4  ;;  %s960_s29 = scalar_lea.hbm %s1004_s3, %s564_s23  ;;  %s955_s22 = int_to_ptr.vmem [resolvable:$true] %s464_s22 }
  0x4e   : > { %280 = vmatpush1.bf16.msra.mxu0 %v661_v4  ;;  %v221_v12 = vrot.slane %v212_v11, %v220_v10  ;;  %v217_v17 = vrot.slane %v212_v11, %v216_v13  ;;  %v225_v31 = vrot.slane %v212_v11, %v224_v30  ;;  %s451_s30 = scalar_lea.sflag [#allocation4], %s927_s11  ;;  %s722_s4 = scalar_lea.vmem %s955_s22, 128 }
  0x4f   : > { %582 = vmatprep.subr.bf16.mxu0 %v797_v7  ;;  %p723_p8 = scmp.ne.s32.totalorder %s955_s22, %s722_s4  ;;  %p1020_p3 = scmp.ne.s32.totalorder %s1014_s6, 0 }
  0x50   : > { %577 = vmatpush3.bf16.msra.mxu1 %v663_v24  ;;  %s799_s16 = smov [#allocation7]  }
  0x51   : > { %560 = vmatmul.mubr.msk.bf16.vlgmr.msra.gmra.mxu0 %vm261_vm0, %v203_v6  ;;  %588 = vmatprep.subr.bf16.mxu1 %v797_v7  ;;  %p724_p11 = pnand %p723_p8, %p1020_p3  ;;  %s726_s8 = sshll.u32 %s799_s16, 4  ;;  %s727_s8 = int_to_ptr.vmem [resolvable:$false] %s726_s8 }
  0x52   : > { %584 = vmatprep.mubr.msk.bf16.mxu0 %vm798_vm1, %v797_v7  ;;  %s728_s7 = scalar_lea.vmem %s727_s8, 256  ;;  %p729_p10 = scmp.lt.s32.totalorder %s955_s22, %s727_s8 }
  0x53   : > { %579 = vmatmul.mubr.msk.bf16.vlgmr.msra.gmra.mxu1 %vm261_vm0, %v203_v6  ;;  %p725_p7 = pneg %p724_p11  ;;  %p730_p2 = scmp.lt.s32.totalorder %s728_s7, %s722_s4 }
  0x54   : > { %590 = vmatprep.mubr.msk.bf16.mxu1 %vm798_vm1, %v797_v7 }
  0x55   : > { %p731_p13 = por %p730_p2, %p729_p10 }
  0x57   : > { %p732_p0 = pnand %p731_p13, %p725_p7 }
 0x111   : > { %v299_v14 = vpop.f32.mrf.mxu0 }
 0x112   : > { %v300_v21 = vadd.f32 %v299_v14, %v217_v17 }
 0x113   : > { %v301_v15 = vpop.f32.mrf.mxu0  ;;  %v340_v32 = vpop.f32.mrf.mxu1 }
 0x114   : > { %v302_v16 = vadd.f32 %v301_v15, %v221_v12  ;;  %v346_v22 = vpack.c.bf16 %v300_v21, %v300_v21  ;;  %v341_v33 = vadd.f32 %v340_v32, %v225_v31 }
 0x115   : > { %v303_v18 = vpop.f32.mrf.mxu0  ;;  %v580_v34 = vpop.f32.mrf.mxu1 }
 0x116   : > { %v347_v19 = vpack.c.bf16 %v302_v16, %v302_v16  ;;  %v348_v35 = vpack.c.bf16 %v341_v33, %v341_v33 }
 0x117   : > { %v304_v20 = vpop.f32.mrf.mxu0  ;;  %v343_v36 = vpop.f32.mrf.mxu1 }
 0x118   : > { %583 = vmatpush3.bf16.xpose.msra.mxu0 %v347_v19  ;;  %v407_v37 = vsel %vm405_vm3, %v348_v35, 0 }
 0x119   : > { %v581_v38 = vpop.f32.mrf.mxu1  ;;  %589 = vmatpush3.bf16.msra.mxu1 %v407_v37 }
 0x11f   : > { %585 = vmatmul.mubr.bf16.vlgmr.msra.gmra.mxu0 %v346_v22 }
 0x1df   : > { %v383_v25 = vpop.f32.mrf.mxu0 }
 0x1e0   : > { %v390_v26 = vsel %vm389_vm2, %v383_v25, -inf }
 0x1e1   : > { %391 = vmax.xlane.f32.xlu0 %v390_v26  ;;  %v586_v27 = vpop.f32.mrf.mxu0 }
 0x1e3   : > { %v386_v28 = vpop.f32.mrf.mxu0 }
 0x1e5   : > { %v587_v29 = vpop.f32.mrf.mxu0 }
 0x26a   : > { %v392_v39 = vpop.xlane.xlu0 %391 }
 0x26b   : > { %v393_v40 = vsub.f32 %v383_v25, %v392_v39 }
 0x26d   : > { %v394_v41 = vmul.f32 1.442695, %v393_v40 }
 0x26f   : > { %664 = vpow2.f32 %v394_v41 }
 0x27c   : > { %v665_v42 = vpop.eup %664 }
 0x27d   : > { %v396_v43 = vsel %vm389_vm2, %v665_v42, 0.0 }
 0x27e   : > { %397 = vadd.xlane.f32.xlu0 %v396_v43 }
 0x307   : > { %v398_v44 = vpop.xlane.xlu0 %397 }
 0x308   : > { %666 = vrcp.f32 %v398_v44 }
 0x315   : > { %v667_v45 = vpop.eup %666 }
 0x316   : > { %v400_v46 = vmul.f32 %v667_v45, %v665_v42 }
 0x318   : > { %v401_v47 = vpack.c.bf16 %v400_v46, %v400_v46 }
 0x31a   : > { %591 = vmatmul.mubr.msk.bf16.vlgmr.msra.gmra.mxu1 %vm389_vm2, %v401_v47 }
 0x3da   : > { %v443_v48 = vpop.f32.mrf.mxu1 }
 0x3db   : > { %449 = vst [vmem:[%s200_s17] sm:$0xff] %v443_v48 }
 0x3dc   : > { %v592_v49 = vpop.f32.mrf.mxu1 }
 0x3dd   : > { %735 = shalt.err (!%p732_p0)
}
 0x3de   : > { %s736_s9 = scalar_lea.hbm %s960_s29, 128  ;;  %s740_s21 = scalar_lea.hbm %s1004_s3, 256 }
 0x3df   : > { %p737_p5 = scmp.ne.s32.totalorder %s960_s29, %s736_s9  ;;  %p741_p1 = scmp.lt.s32.totalorder %s960_s29, %s1004_s3 }
 0x3e0   : > { %p742_p4 = scmp.lt.s32.totalorder %s740_s21, %s736_s9 }
 0x3e1   : > { %p738_p9 = pnand %p737_p5, %p1020_p3 }
 0x3e2   : > { %p743_p6 = por %p742_p4, %p741_p1 }
 0x3e3   : > { %p739_p12 = pneg %p738_p9 }
 0x3e5   : > { %p744_p8 = pnand %p743_p6, %p739_p12 }
 0x3e7   : > { %747 = shalt.err (!%p744_p8)
}
 0x3e8   : > { %600 = dma.vmem_to_hbm [thread:$0]  (%p1020_p3), %s955_s22, 128, %s960_s29, %s451_s30   ;;  %v446_v50 = vpop.f32.mrf.mxu1 }
 0x3ea   : > { %v593_v51 = vpop.f32.mrf.mxu1 }
 0x3eb PF: > { %s476_s18 = sand.u32 1, %s778_s12   ;;  %p1021_p11 = scmp.ne.s32.totalorder %s1010_s19, 0 }
 0x3ec   : > { %p1022_p7 = scmp.ge.s32.totalorder %s790_s15, 2  ;;  %s477_s20 = scalar_lea.sflag [#allocation4], %s476_s18 }
 0x3ee   : > { %p611_p10 = pnand %p1022_p7, %p1021_p11 }
 0x3f0   : > { %p612_p2 = pneg %p611_p10 }
 0x3f2   : > { %773 = dma.done.wait (%p612_p2), %s477_s20, 128  }
 0x3f3   : > { %775 = vsyncadd (%p612_p2), %s477_s20, 4294967168  ;;  %p17_p3 = scmp.ge.s32.totalorder %s874_s24, 4   ;;  %s1023_s12 = smov %s782_s13 }
 0x3f4   : > { %s1024_s13 = smov %s786_s14  ;;  %s1025_s14 = smov %s891_s5 }
 0x3f5   : > { %s1026_s15 = smov %s874_s24  ;;  %19 = sbr.rel (!%p17_p3) target bundleno = 6 (0x6), region = 81 }
 0x3fa   :  { %482 = vsyncpa [#allocation3], 1 }
 0x3fb   :  { %484 = vsyncpa [#allocation3 + $0x1], 1 }
 0x3fc   :  { %485 = vsyncpa [#allocation6], 1 }
 0x3fd   :  { %486 = vsyncpa [#allocation4], 1 }
 0x3fe   :  { %488 = vsyncpa [#allocation4 + $0x1], 1 }

</bundles_post_ra>
